<compile_context>
chip_gen: v7x
topology: tpu7x:2x2x1
jax: 0.10.0
libtpu: 0.0.40
codegen_flags: <defaults>
</compile_context>

<pallas_src>
import jax
import jax.numpy as jnp
from jax.experimental import pallas as pl
from jax.experimental.pallas import tpu as pltpu

_HIDDEN = 256


def _round_up(x, m):
    return ((x + m - 1) // m) * m


def _actor_kernel(max_a_ref,                      # (1,1) f32 in SMEM
                  state_ref,                      # (tm, state_dim) f32, streamed
                  w1_ref, b1_ref,                 # (state_dim,256) bf16 / (1,256) f32, resident
                  w2_ref, b2_ref,                 # (256,256) bf16 / (1,256) f32, resident
                  w3_ref, b3_ref,                 # (256,Ap) bf16 / (1,Ap) f32, resident
                  out_ref):                       # (tm, Ap) f32, streamed
    """Fused 3-layer MLP: relu(x@W1+b1) -> relu(.@W2+b2) -> max_action*tanh(.@W3+b3)."""
    max_a = max_a_ref[0, 0]

    # bf16 operands feed the MXU's native path; accumulation is f32.
    x = state_ref[...].astype(jnp.bfloat16)

    h1 = jnp.dot(x, w1_ref[...], preferred_element_type=jnp.float32) + b1_ref[...]
    h1 = jnp.maximum(h1, 0.0).astype(jnp.bfloat16)

    h2 = jnp.dot(h1, w2_ref[...], preferred_element_type=jnp.float32) + b2_ref[...]
    h2 = jnp.maximum(h2, 0.0).astype(jnp.bfloat16)

    h3 = jnp.dot(h2, w3_ref[...], preferred_element_type=jnp.float32) + b3_ref[...]
    out_ref[...] = (max_a * jnp.tanh(h3)).astype(out_ref.dtype)


def actor_forward(state, params, max_action, *, tm_max=512):
    """state: [batch, state_dim] f32. params: dict with w1,b1,w2,b2,w3,b3 (W as [in,out])."""
    batch, state_dim = state.shape
    hidden = params["w1"].shape[1]
    action_dim = params["w3"].shape[1]

    # --- batch tiling: largest tile up to tm_max, pad batch to a tile multiple ---
    tm = min(tm_max, _round_up(batch, 8))
    padded_batch = _round_up(batch, tm)
    if padded_batch != batch:
        state = jnp.pad(state, ((0, padded_batch - batch), (0, 0)))
    grid = (padded_batch // tm,)

    # --- lane-pad the action dim so the final store is lane-dense (128 lanes) ---
    padded_adim = _round_up(action_dim, 128)
    w3 = params["w3"]
    b3 = params["b3"]
    if padded_adim != action_dim:
        w3 = jnp.pad(w3, ((0, 0), (0, padded_adim - action_dim)))
        b3 = jnp.pad(b3, (0, padded_adim - action_dim))

    # --- weights in bf16, biases as f32 [1, N] rows (broadcast over batch) ---
    w1 = params["w1"].astype(jnp.bfloat16)
    w2 = params["w2"].astype(jnp.bfloat16)
    w3 = w3.astype(jnp.bfloat16)
    b1 = params["b1"].reshape(1, -1).astype(jnp.float32)
    b2 = params["b2"].reshape(1, -1).astype(jnp.float32)
    b3 = b3.reshape(1, -1).astype(jnp.float32)

    # Runtime scalar -> SMEM (no recompile per max_action value).
    max_a = jnp.asarray(max_action, jnp.float32).reshape(1, 1)

    # Weights / biases: constant block index across the batch grid -> VMEM-resident.
    def resident(a):
        n = a.ndim
        return pl.BlockSpec(a.shape, lambda i, _n=n: (0,) * _n)

    out = pl.pallas_call(
        _actor_kernel,
        out_shape=jax.ShapeDtypeStruct((padded_batch, padded_adim), jnp.float32),
        grid=grid,
        in_specs=[
            pl.BlockSpec(memory_space=pltpu.MemorySpace.SMEM),       # max_action scalar
            pl.BlockSpec((tm, state_dim), lambda i: (i, 0)),         # streamed state tile
            resident(w1), resident(b1),
            resident(w2), resident(b2),
            resident(w3), resident(b3),
        ],
        out_specs=pl.BlockSpec((tm, padded_adim), lambda i: (i, 0)),  # streamed out tile
        compiler_params=pltpu.CompilerParams(
            dimension_semantics=("parallel",),        # shard batch tiles across TCs (v7x)
            vmem_limit_bytes=32 * 1024 * 1024,        # explicit, v7x-safe (64 MiB phys)
        ),
    )(max_a, state, w1, b1, w2, b2, w3, b3)

    return out[:batch, :action_dim]


def init_actor_params(key, state_dim, action_dim, hidden=_HIDDEN):
    """Deterministic init mimicking PyTorch nn.Linear default (uniform +/- 1/sqrt(fan_in)).
    Weights are stored as [in, out] (transposed vs. torch's [out, in])."""
    def linear(k, fan_in, fan_out):
        kw, kb = jax.random.split(k)
        bound = 1.0 / jnp.sqrt(jnp.float32(fan_in))
        w = jax.random.uniform(kw, (fan_in, fan_out), jnp.float32, -bound, bound)
        b = jax.random.uniform(kb, (fan_out,), jnp.float32, -bound, bound)
        return w, b

    k1, k2, k3 = jax.random.split(key, 3)
    w1, b1 = linear(k1, state_dim, hidden)
    w2, b2 = linear(k2, hidden, hidden)
    w3, b3 = linear(k3, hidden, action_dim)
    return {"w1": w1, "b1": b1, "w2": w2, "b2": b2, "w3": w3, "b3": b3}


def actor_forward_ref(state, params, max_action):
    """Pure-JAX f32 reference for correctness check."""
    h = jnp.maximum(state @ params["w1"] + params["b1"], 0.0)
    h = jnp.maximum(h @ params["w2"] + params["b2"], 0.0)
    return max_action * jnp.tanh(h @ params["w3"] + params["b3"])


if __name__ == "__main__":
    # Small, deterministic problem consistent with the module's forward (A1 head).
    batch, state_dim, action_dim = 2, 16, 8
    max_action = 1.0

    key = jax.random.PRNGKey(0)
    k_params, k_state = jax.random.split(key)
    params = init_actor_params(k_params, state_dim, action_dim)
    state = jax.random.normal(k_state, (batch, state_dim), jnp.float32)

    out = actor_forward(state, params, max_action)
    out = jax.block_until_ready(out)

    ref = actor_forward_ref(state, params, max_action)
    assert out.shape == (batch, action_dim)
    # bf16 weight/activation inputs to the MXU (f32 accumulation) -> loosened tolerance.
    assert jnp.allclose(out, ref, atol=2e-2, rtol=2e-2), "mismatch vs reference"

    print("KERNEL_OK")
</pallas_src>

<mosaic_0001>
module attributes {stable_mosaic.version = 11 : i64} {
  func.func @_actor_kernel(%arg0: i32, %arg1: memref<1x1xf32, #tpu.memory_space<smem>>, %arg2: memref<8x16xf32, #tpu.memory_space<vmem>>, %arg3: memref<16x256xbf16, #tpu.memory_space<vmem>>, %arg4: memref<1x256xf32, #tpu.memory_space<vmem>>, %arg5: memref<256x256xbf16, #tpu.memory_space<vmem>>, %arg6: memref<1x256xf32, #tpu.memory_space<vmem>>, %arg7: memref<256x128xbf16, #tpu.memory_space<vmem>>, %arg8: memref<1x128xf32, #tpu.memory_space<vmem>>, %arg9: memref<8x128xf32, #tpu.memory_space<vmem>>) attributes {dimension_semantics = [#tpu.dimension_semantics<parallel>], iteration_bounds = array<i64: 1>, scalar_prefetch = 0 : i64, scratch_operands = 0 : i64, tpu.core_type = #tpu.core_type<tc>, window_params = [{transform_indices = @transform_0, window_bounds = array<i64: 1, 1>}, {transform_indices = @transform_1, window_bounds = array<i64: 8, 16>}, {pipeline_mode = #tpu.pipeline_mode<synchronous>, transform_indices = @transform_2, window_bounds = array<i64: 16, 256>}, {pipeline_mode = #tpu.pipeline_mode<synchronous>, transform_indices = @transform_3, window_bounds = array<i64: 1, 256>}, {pipeline_mode = #tpu.pipeline_mode<synchronous>, transform_indices = @transform_4, window_bounds = array<i64: 256, 256>}, {pipeline_mode = #tpu.pipeline_mode<synchronous>, transform_indices = @transform_5, window_bounds = array<i64: 1, 256>}, {pipeline_mode = #tpu.pipeline_mode<synchronous>, transform_indices = @transform_6, window_bounds = array<i64: 256, 128>}, {pipeline_mode = #tpu.pipeline_mode<synchronous>, transform_indices = @transform_7, window_bounds = array<i64: 1, 128>}, {transform_indices = @transform_8, window_bounds = array<i64: 8, 128>}]} {
    %c0 = arith.constant 0 : index
    %c0_0 = arith.constant 0 : index
    %0 = memref.load %arg1[%c0, %c0_0] : memref<1x1xf32, #tpu.memory_space<smem>>
    %c0_1 = arith.constant 0 : index
    %c0_2 = arith.constant 0 : index
    %1 = vector.load %arg2[%c0_1, %c0_2] : memref<8x16xf32, #tpu.memory_space<vmem>>, vector<8x16xf32>
    %2 = arith.truncf %1 : vector<8x16xf32> to vector<8x16xbf16>
    %c0_3 = arith.constant 0 : index
    %c0_4 = arith.constant 0 : index
    %3 = vector.load %arg3[%c0_3, %c0_4] : memref<16x256xbf16, #tpu.memory_space<vmem>>, vector<16x256xbf16>
    %cst = arith.constant dense<0.000000e+00> : vector<8x256xf32>
    %4 = tpu.matmul %2, %3, %cst {dimension_numbers = #tpu.dot_dimension_numbers<[1], [0], [0], [1], [0, 0, 1, 1], [], []>} : vector<8x16xbf16>, vector<16x256xbf16>, vector<8x256xf32> -> vector<8x256xf32>
    %c0_5 = arith.constant 0 : index
    %c0_6 = arith.constant 0 : index
    %5 = vector.load %arg4[%c0_5, %c0_6] : memref<1x256xf32, #tpu.memory_space<vmem>>, vector<1x256xf32>
    %6 = vector.broadcast %5 : vector<1x256xf32> to vector<8x256xf32>
    %7 = arith.addf %4, %6 : vector<8x256xf32>
    %cst_7 = arith.constant 0.000000e+00 : f32
    %8 = vector.broadcast %cst_7 : f32 to vector<8x256xf32>
    %9 = arith.maximumf %7, %8 : vector<8x256xf32>
    %10 = arith.truncf %9 : vector<8x256xf32> to vector<8x256xbf16>
    %c0_8 = arith.constant 0 : index
    %c0_9 = arith.constant 0 : index
    %11 = vector.load %arg5[%c0_8, %c0_9] : memref<256x256xbf16, #tpu.memory_space<vmem>>, vector<256x256xbf16>
    %cst_10 = arith.constant dense<0.000000e+00> : vector<8x256xf32>
    %12 = tpu.matmul %10, %11, %cst_10 {dimension_numbers = #tpu.dot_dimension_numbers<[1], [0], [0], [1], [0, 0, 1, 1], [], []>} : vector<8x256xbf16>, vector<256x256xbf16>, vector<8x256xf32> -> vector<8x256xf32>
    %c0_11 = arith.constant 0 : index
    %c0_12 = arith.constant 0 : index
    %13 = vector.load %arg6[%c0_11, %c0_12] : memref<1x256xf32, #tpu.memory_space<vmem>>, vector<1x256xf32>
    %14 = vector.broadcast %13 : vector<1x256xf32> to vector<8x256xf32>
    %15 = arith.addf %12, %14 : vector<8x256xf32>
    %cst_13 = arith.constant 0.000000e+00 : f32
    %16 = vector.broadcast %cst_13 : f32 to vector<8x256xf32>
    %17 = arith.maximumf %15, %16 : vector<8x256xf32>
    %18 = arith.truncf %17 : vector<8x256xf32> to vector<8x256xbf16>
    %c0_14 = arith.constant 0 : index
    %c0_15 = arith.constant 0 : index
    %19 = vector.load %arg7[%c0_14, %c0_15] : memref<256x128xbf16, #tpu.memory_space<vmem>>, vector<256x128xbf16>
    %cst_16 = arith.constant dense<0.000000e+00> : vector<8x128xf32>
    %20 = tpu.matmul %18, %19, %cst_16 {dimension_numbers = #tpu.dot_dimension_numbers<[1], [0], [0], [1], [0, 0, 1, 1], [], []>} : vector<8x256xbf16>, vector<256x128xbf16>, vector<8x128xf32> -> vector<8x128xf32>
    %c0_17 = arith.constant 0 : index
    %c0_18 = arith.constant 0 : index
    %21 = vector.load %arg8[%c0_17, %c0_18] : memref<1x128xf32, #tpu.memory_space<vmem>>, vector<1x128xf32>
    %22 = vector.broadcast %21 : vector<1x128xf32> to vector<8x128xf32>
    %23 = arith.addf %20, %22 : vector<8x128xf32>
    %24 = math.tanh %23 : vector<8x128xf32>
    %25 = vector.broadcast %0 : f32 to vector<8x128xf32>
    %26 = arith.mulf %25, %24 : vector<8x128xf32>
    %c0_19 = arith.constant 0 : index
    %c0_20 = arith.constant 0 : index
    %27 = vector.load %arg9[%c0_19, %c0_20] : memref<8x128xf32, #tpu.memory_space<vmem>>, vector<8x128xf32>
    tpu.vector_store %arg9[%c0_19, %c0_20], %26 {strides = array<i32>} : memref<8x128xf32, #tpu.memory_space<vmem>>, vector<8x128xf32>,
    return
  }
  func.func @transform_0(%arg0: i32) -> (i32, i32) {
    %c0_i32 = arith.constant 0 : i32
    %c0_i32_0 = arith.constant 0 : i32
    %c0_i32_1 = arith.constant 0 : i32
    return %c0_i32, %c0_i32_0 : i32, i32
  }
  func.func @transform_1(%arg0: i32) -> (i32, i32) {
    %c0_i32 = arith.constant 0 : i32
    %c0_i32_0 = arith.constant 0 : i32
    return %arg0, %c0_i32 : i32, i32
  }
  func.func @transform_2(%arg0: i32) -> (i32, i32) {
    %c0_i32 = arith.constant 0 : i32
    %c0_i32_0 = arith.constant 0 : i32
    %c0_i32_1 = arith.constant 0 : i32
    return %c0_i32, %c0_i32_0 : i32, i32
  }
  func.func @transform_3(%arg0: i32) -> (i32, i32) {
    %c0_i32 = arith.constant 0 : i32
    %c0_i32_0 = arith.constant 0 : i32
    %c0_i32_1 = arith.constant 0 : i32
    return %c0_i32, %c0_i32_0 : i32, i32
  }
  func.func @transform_4(%arg0: i32) -> (i32, i32) {
    %c0_i32 = arith.constant 0 : i32
    %c0_i32_0 = arith.constant 0 : i32
    %c0_i32_1 = arith.constant 0 : i32
    return %c0_i32, %c0_i32_0 : i32, i32
  }
  func.func @transform_5(%arg0: i32) -> (i32, i32) {
    %c0_i32 = arith.constant 0 : i32
    %c0_i32_0 = arith.constant 0 : i32
    %c0_i32_1 = arith.constant 0 : i32
    return %c0_i32, %c0_i32_0 : i32, i32
  }
  func.func @transform_6(%arg0: i32) -> (i32, i32) {
    %c0_i32 = arith.constant 0 : i32
    %c0_i32_0 = arith.constant 0 : i32
    %c0_i32_1 = arith.constant 0 : i32
    return %c0_i32, %c0_i32_0 : i32, i32
  }
  func.func @transform_7(%arg0: i32) -> (i32, i32) {
    %c0_i32 = arith.constant 0 : i32
    %c0_i32_0 = arith.constant 0 : i32
    %c0_i32_1 = arith.constant 0 : i32
    return %c0_i32, %c0_i32_0 : i32, i32
  }
  func.func @transform_8(%arg0: i32) -> (i32, i32) {
    %c0_i32 = arith.constant 0 : i32
    %c0_i32_0 = arith.constant 0 : i32
    return %arg0, %c0_i32 : i32, i32
  }
}

</mosaic_0001>

<bundles_post_ra>
// kernel: tpu_custom_call.1
= control target key start
LH: loop header
LB: loop body
LE: loop exit
PB: predicated region body
PF: predicated region fallthrough
CT: control target
= control target key end

     0   :  { %14 = vsyncpa [#allocation4], 0  ;;  %s1010_s0 = inlined_call_operand.<no memory space> [shape: f32[1,1], index: 0, kind: input, shape index: {}]   ;;  %s1011_s1 = inlined_call_operand.hbm [shape: f32[8,16], index: 1, kind: input, shape index: {}]   ;;  %s1012_s2 = inlined_call_operand.hbm [shape: bf16[16,256], index: 2, kind: input, shape index: {}]   ;;  %s1013_s3 = inlined_call_operand.vmem [shape: f32[1,256], index: 3, kind: input, shape index: {}]   ;;  %s1014_s4 = inlined_call_operand.hbm [shape: bf16[256,256], index: 4, kind: input, shape index: {}]   ;;  %s1015_s5 = inlined_call_operand.vmem [shape: f32[1,256], index: 5, kind: input, shape index: {}]   ;;  %s1016_s6 = inlined_call_operand.hbm [shape: bf16[256,128], index: 6, kind: input, shape index: {}]   ;;  %s1017_s7 = inlined_call_operand.vmem [shape: f32[1,128], index: 7, kind: input, shape index: {}]   ;;  %s1018_s8 = inlined_call_operand.hbm [shape: f32[8,128], index: 8, kind: output, shape index: {}]  }
   0x1   :  { %15 = vsyncpa [#allocation7], 0 }
   0x2   :  { %16 = vsyncpa [#allocation10], 0 }
   0x3   :  { %17 = vsyncpa [#allocation5], 0  ;;  %s877_s27 = smov [#allocation6]   ;;  %s759_s9 = scalar_lea.hbm %s1012_s2, 256 }
   0x4   :  { %s35_s28 = sshll.u32 %s877_s27, 4  ;;  %p760_p0 = scmp.ne.s32.totalorder %s1012_s2, %s759_s9  ;;  %s36_s28 = int_to_ptr.vmem [resolvable:$true] %s35_s28 }
   0x5   :  { %p763_p1 = scmp.lt.u32.totalorder %s759_s9, %s1012_s2 }
   0x7   :  { %p765_p2 = pnand %p763_p1, %p760_p0 }
   0x9   :  { %768 = shalt.err (!%p765_p2)
}
   0xa   :  { %s769_s14 = scalar_lea.vmem %s36_s28, 256  ;;  %p774_p4 = scmp.lt.s32.totalorder %s36_s28, %s36_s28 }
   0xb   :  { %p770_p3 = scmp.ne.s32.totalorder %s36_s28, %s769_s14  ;;  %p775_p5 = scmp.lt.s32.totalorder %s769_s14, %s769_s14 }
   0xd   :  { %p776_p6 = por %p775_p5, %p774_p4 }
   0xf   :  { %p777_p7 = pnand %p776_p6, %p770_p3 }
  0x11   :  { %780 = shalt.err (!%p777_p7)
}
  0x12   :  { %s878_s15 = smov 128   ;;  %s879_s16 = smov 8  }
  0x13   :  { %41 = dma.hbm_to_vmem [thread:$0]  %s1012_s2, 256, %s36_s28, [#allocation7], %s878_s15, %s878_s15, %s879_s16  }
  0x14   :  { %s880_s19 = smov [#allocation3]   ;;  %s881_s21 = smov [#allocation8]  }
  0x15   :  { %s26_s20 = sshll.u32 %s880_s19, 4  ;;  %s49_s22 = sshll.u32 %s881_s21, 4  ;;  %s27_s20 = int_to_ptr.vmem [resolvable:$true] %s26_s20  ;;  %s50_s22 = int_to_ptr.vmem [resolvable:$true] %s49_s22 }
  0x16   :  { %s781_s25 = scalar_lea.hbm %s1011_s1, 128 }
  0x17   :  { %p782_p8 = scmp.ne.s32.totalorder %s1011_s1, %s781_s25  ;;  %p785_p9 = scmp.lt.u32.totalorder %s781_s25, %s1011_s1 }
  0x19   :  { %p787_p10 = pnand %p785_p9, %p782_p8 }
  0x1b   :  { %790 = shalt.err (!%p787_p10)
}
  0x1c   :  { %s791_s2 = scalar_lea.vmem %s27_s20, 128  ;;  %p796_p12 = scmp.lt.s32.totalorder %s27_s20, %s27_s20 }
  0x1d   :  { %p792_p11 = scmp.ne.s32.totalorder %s27_s20, %s791_s2  ;;  %p797_p13 = scmp.lt.s32.totalorder %s791_s2, %s791_s2 }
  0x1f   :  { %p798_p0 = por %p797_p13, %p796_p12 }
  0x21   :  { %p799_p1 = pnand %p798_p0, %p792_p11 }
  0x23   :  { %802 = shalt.err (!%p799_p1)
}
  0x24   :  { %29 = dma.hbm_to_vmem [thread:$0]  %s1011_s1, 128, %s27_s20, [#allocation4]  }
  0x25   :  { %s803_s12 = scalar_lea.hbm %s1014_s4, 4096 }
  0x26   :  { %p804_p2 = scmp.ne.s32.totalorder %s1014_s4, %s803_s12  ;;  %p807_p3 = scmp.lt.u32.totalorder %s803_s12, %s1014_s4 }
  0x28   :  { %p809_p4 = pnand %p807_p3, %p804_p2 }
  0x2a   :  { %812 = shalt.err (!%p809_p4)
}
  0x2b   :  { %s813_s19 = scalar_lea.vmem %s50_s22, 4096  ;;  %p818_p6 = scmp.lt.s32.totalorder %s50_s22, %s50_s22 }
  0x2c   :  { %p814_p5 = scmp.ne.s32.totalorder %s50_s22, %s813_s19  ;;  %p819_p7 = scmp.lt.s32.totalorder %s813_s19, %s813_s19 }
  0x2e   :  { %p820_p8 = por %p819_p7, %p818_p6 }
  0x30   :  { %p821_p9 = pnand %p820_p8, %p814_p5 }
  0x32   :  { %824 = shalt.err (!%p821_p9)
}
  0x33   :  { %55 = dma.hbm_to_vmem [thread:$0]  %s1014_s4, 4096, %s50_s22, [#allocation7], %s878_s15, %s878_s15, %s879_s16  }
  0x34   :  { %s882_s21 = smov [#allocation9]   ;;  %s825_s26 = scalar_lea.hbm %s1016_s6, 2048 }
  0x35   :  { %s63_s23 = sshll.u32 %s882_s21, 4  ;;  %p826_p10 = scmp.ne.s32.totalorder %s1016_s6, %s825_s26  ;;  %s64_s23 = int_to_ptr.vmem [resolvable:$true] %s63_s23 }
  0x36   :  { %p829_p11 = scmp.lt.u32.totalorder %s825_s26, %s1016_s6 }
  0x38   :  { %p831_p12 = pnand %p829_p11, %p826_p10 }
  0x3a   :  { %834 = shalt.err (!%p831_p12)
}
  0x3b   :  { %s835_s28 = scalar_lea.vmem %s64_s23, 2048  ;;  %p840_p0 = scmp.lt.s32.totalorder %s64_s23, %s64_s23 }
  0x3c   :  { %p836_p13 = scmp.ne.s32.totalorder %s64_s23, %s835_s28  ;;  %p841_p1 = scmp.lt.s32.totalorder %s835_s28, %s835_s28 }
  0x3e   :  { %p842_p2 = por %p841_p1, %p840_p0 }
  0x40   :  { %p843_p3 = pnand %p842_p2, %p836_p13 }
  0x42   :  { %846 = shalt.err (!%p843_p3)
}
  0x43   :  { %s883_s4 = smov 64   ;;  %s884_s15 = smov 4  }
  0x44   :  { %69 = dma.hbm_to_vmem [thread:$0]  %s1016_s6, 2048, %s64_s23, [#allocation10], %s883_s4, %s883_s4, %s884_s15  }
  0x45   :  { %869 = dma.done.wait [#allocation4], 128  }
  0x46   :  { %870 = vsyncadd [#allocation4], 4294967168 }
  0x47   :  { %871 = dma.done.wait [#allocation7], 4352  }
  0x48   :  { %872 = vsyncadd [#allocation7], 4294962944 }
  0x49   :  { %873 = dma.done.wait [#allocation10], 2048  }
  0x4a   :  { %874 = vsyncadd [#allocation10], 4294965248  ;;  %v885_v0 = vmov 0   ;;  %v690_v1 = vld [vmem:[#allocation6 + $0x4] ss:$8 sps:$4 sm:$0xff]   ;;  %v86_v3 = vld [vmem:[#allocation3] sm:$0xff]  ;;  %v92_v49 = vlaneseq }
  0x4b   :  { %148 = vmatprep.mubr.bf16.mxu0 %v885_v0  ;;  %v692_v2 = vld [vmem:[#allocation6] ss:$8 sps:$4 sm:$0xff]   ;;  %116 = vmatprep.subr.bf16.mxu0 %v690_v1  ;;  %v87_v4 = vpack.c.bf16 %v86_v3, %v86_v3  ;;  %v693_v5 = vld [vmem:[#allocation8 + $0x4] ss:$8 sps:$4 sm:$0xff]   ;;  %v695_v6 = vld [vmem:[#allocation8] ss:$8 sps:$4 sm:$0xff]  }
  0x4c   :  { %117 = vmatpush1.bf16.msra.mxu0 %v692_v2  ;;  %vm112_vm0 = vcmask 130048   ;;  %v696_v7 = vld [vmem:[#allocation8 + $0x14] ss:$8 sps:$4 sm:$0xff]   ;;  %365 = vmatprep.subr.bf16.mxu1 %v693_v5  ;;  %v698_v8 = vld [vmem:[#allocation8 + $0x10] ss:$8 sps:$4 sm:$0xff]   ;;  %v741_v37 = vld [vmem:[#allocation9 + $0x40] sm:$0xff]  }
  0x4d   :  { %366 = vmatpush1.bf16.msra.mxu1 %v695_v6  ;;  %v699_v9 = vld [vmem:[#allocation8 + $0x24] ss:$8 sps:$4 sm:$0xff]   ;;  %v701_v10 = vld [vmem:[#allocation8 + $0x20] ss:$8 sps:$4 sm:$0xff]   ;;  %v702_v11 = vld [vmem:[#allocation8 + $0x34] ss:$8 sps:$4 sm:$0xff]   ;;  %658 = vmatprep.subr.bf16.mxu0 %v741_v37 }
  0x4e   :  { %367 = vmatprep.subr.bf16.mxu1 %v696_v7  ;;  %v704_v12 = vld [vmem:[#allocation8 + $0x30] ss:$8 sps:$4 sm:$0xff]   ;;  %v705_v13 = vld [vmem:[#allocation8 + $0x44] ss:$8 sps:$4 sm:$0xff]   ;;  %v707_v14 = vld [vmem:[#allocation8 + $0x40] ss:$8 sps:$4 sm:$0xff]  }
  0x4f   :  { %608 = vmatmul.mubr.msk.bf16.vlgmr.msra.gmra.mrb[0].mxu0 %vm112_vm0, %v87_v4  ;;  %v708_v15 = vld [vmem:[#allocation8 + $0x54] ss:$8 sps:$4 sm:$0xff]   ;;  %v710_v16 = vld [vmem:[#allocation8 + $0x50] ss:$8 sps:$4 sm:$0xff]   ;;  %v711_v17 = vld [vmem:[#allocation8 + $0x64] ss:$8 sps:$4 sm:$0xff]  }
  0x50   :  { %v713_v18 = vld [vmem:[#allocation8 + $0x60] ss:$8 sps:$4 sm:$0xff]   ;;  %v714_v19 = vld [vmem:[#allocation8 + $0x74] ss:$8 sps:$4 sm:$0xff]   ;;  %v716_v20 = vld [vmem:[#allocation8 + $0x70] ss:$8 sps:$4 sm:$0xff]  }
  0x51   :  { %368 = vmatpush1.bf16.msra.mxu1 %v698_v8  ;;  %v717_v21 = vld [vmem:[#allocation8 + $0x84] ss:$8 sps:$4 sm:$0xff]   ;;  %v719_v22 = vld [vmem:[#allocation8 + $0x80] ss:$8 sps:$4 sm:$0xff]   ;;  %v720_v23 = vld [vmem:[#allocation8 + $0x94] ss:$8 sps:$4 sm:$0xff]  }
  0x52   :  { %369 = vmatprep.subr.bf16.mxu1 %v699_v9  ;;  %v722_v24 = vld [vmem:[#allocation8 + $0x90] ss:$8 sps:$4 sm:$0xff]   ;;  %v723_v25 = vld [vmem:[#allocation8 + $0xa4] ss:$8 sps:$4 sm:$0xff]   ;;  %v725_v26 = vld [vmem:[#allocation8 + $0xa0] ss:$8 sps:$4 sm:$0xff]  }
  0x53   :  { %v726_v27 = vld [vmem:[#allocation8 + $0xb4] ss:$8 sps:$4 sm:$0xff]   ;;  %v728_v28 = vld [vmem:[#allocation8 + $0xb0] ss:$8 sps:$4 sm:$0xff]   ;;  %v729_v29 = vld [vmem:[#allocation8 + $0xc4] ss:$8 sps:$4 sm:$0xff]  }
  0x54   :  { %v731_v30 = vld [vmem:[#allocation8 + $0xc0] ss:$8 sps:$4 sm:$0xff]   ;;  %v732_v31 = vld [vmem:[#allocation8 + $0xd4] ss:$8 sps:$4 sm:$0xff]   ;;  %v734_v32 = vld [vmem:[#allocation8 + $0xd0] ss:$8 sps:$4 sm:$0xff]  }
  0x55   :  { %370 = vmatpush1.bf16.msra.mxu1 %v701_v10  ;;  %v735_v33 = vld [vmem:[#allocation8 + $0xe4] ss:$8 sps:$4 sm:$0xff]   ;;  %v737_v34 = vld [vmem:[#allocation8 + $0xe0] ss:$8 sps:$4 sm:$0xff]   ;;  %v738_v35 = vld [vmem:[#allocation8 + $0xf4] ss:$8 sps:$4 sm:$0xff]  }
  0x56   :  { %371 = vmatprep.subr.bf16.mxu1 %v702_v11  ;;  %v740_v36 = vld [vmem:[#allocation8 + $0xf0] ss:$8 sps:$4 sm:$0xff]   ;;  %v742_v38 = vld [vmem:[#allocation9] sm:$0xff]   ;;  %v743_v39 = vld [vmem:[#allocation9 + $0x48] sm:$0xff]   ;;  %v93_v50 = vshrl.u32 %v92_v49, 7  ;;  %s886_s14 = smov [#allocation11]  }
  0x57   :  { %659 = vmatpush3.bf16.msra.mxu0 %v742_v38  ;;  %v744_v40 = vld [vmem:[#allocation9 + $0x8] sm:$0xff]   ;;  %v745_v41 = vld [vmem:[#allocation9 + $0x50] sm:$0xff]   ;;  %v747_v43 = vld [vmem:[#allocation9 + $0x58] sm:$0xff]   ;;  %s595_s17 = sshll.u32 %s886_s14, 4  ;;  %s596_s17 = int_to_ptr.vmem [resolvable:$true] %s595_s17 }
  0x58   :  { %660 = vmatprep.subr.bf16.mxu0 %v743_v39  ;;  %v746_v42 = vld [vmem:[#allocation9 + $0x10] sm:$0xff]   ;;  %v748_v44 = vld [vmem:[#allocation9 + $0x18] sm:$0xff]   ;;  %v749_v45 = vld [vmem:[#allocation9 + $0x60] sm:$0xff]   ;;  %v94_v51 = vsub.s32 0, %v93_v50  ;;  %v98_v53 = vsub.s32 1, %v93_v50  ;;  %s847_s18 = scalar_lea.vmem %s596_s17, 128  ;;  %p852_p5 = scmp.lt.s32.totalorder %s596_s17, %s596_s17 }
  0x59   :  { %372 = vmatpush1.bf16.msra.mxu1 %v704_v12  ;;  %v750_v46 = vld [vmem:[#allocation9 + $0x20] sm:$0xff]   ;;  %v751_v47 = vld [vmem:[#allocation9 + $0x68] sm:$0xff]   ;;  %v753_v2 = vld [vmem:[#allocation9 + $0x70] sm:$0xff]   ;;  %p848_p4 = scmp.ne.s32.totalorder %s596_s17, %s847_s18  ;;  %p853_p6 = scmp.lt.s32.totalorder %s847_s18, %s847_s18 }
  0x5a   :  { %373 = vmatprep.subr.bf16.mxu1 %v705_v13  ;;  %v752_v48 = vld [vmem:[#allocation9 + $0x28] sm:$0xff]   ;;  %v754_v3 = vld [vmem:[#allocation9 + $0x30] sm:$0xff]   ;;  %v755_v4 = vld [vmem:[#allocation9 + $0x78] sm:$0xff]  }
  0x5b   :  { %661 = vmatpush3.bf16.msra.mxu0 %v744_v40  ;;  %v90_v52 = vld [vmem:[%s1013_s3] sm:$0x3]  ;;  %v756_v5 = vld [vmem:[#allocation9 + $0x38] sm:$0xff]   ;;  %p854_p7 = por %p853_p6, %p852_p5 }
  0x5c   :  { %662 = vmatprep.subr.bf16.mxu0 %v745_v41  ;;  %v95_v54 = vrot.slane %v90_v52, %v94_v51  ;;  %v99_v55 = vrot.slane %v90_v52, %v98_v53  ;;  %v193_v6 = vld [vmem:[%s1015_s5] sm:$0x3] }
  0x5d   :  { %374 = vmatpush1.bf16.msra.mxu1 %v707_v14  ;;  %v198_v7 = vrot.slane %v193_v6, %v94_v51  ;;  %v202_v8 = vrot.slane %v193_v6, %v98_v53  ;;  %p855_p8 = pnand %p854_p7, %p848_p4 }
  0x5e   :  { %375 = vmatprep.subr.bf16.mxu1 %v708_v15 }
  0x5f   :  { %663 = vmatpush3.bf16.msra.mxu0 %v746_v42 }
  0x60   :  { %664 = vmatprep.subr.bf16.mxu0 %v747_v43 }
  0x61   :  { %376 = vmatpush1.bf16.msra.mxu1 %v710_v16 }
  0x62   :  { %377 = vmatprep.subr.bf16.mxu1 %v711_v17 }
  0x63   :  { %665 = vmatpush3.bf16.msra.mxu0 %v748_v44 }
  0x64   :  { %666 = vmatprep.subr.bf16.mxu0 %v749_v45 }
  0x65   :  { %378 = vmatpush1.bf16.msra.mxu1 %v713_v18 }
  0x66   :  { %379 = vmatprep.subr.bf16.mxu1 %v714_v19 }
  0x67   :  { %667 = vmatpush3.bf16.msra.mxu0 %v750_v46 }
  0x68   :  { %668 = vmatprep.subr.bf16.mxu0 %v751_v47 }
  0x69   :  { %380 = vmatpush1.bf16.msra.mxu1 %v716_v20  ;;  %v641_v20 = vld [vmem:[%s1017_s7] ss:$0 sm:$0xff] }
  0x6a   :  { %381 = vmatprep.subr.bf16.mxu1 %v717_v21 }
  0x6b   :  { %669 = vmatpush3.bf16.msra.mxu0 %v752_v48 }
  0x6c   :  { %670 = vmatprep.subr.bf16.mxu0 %v753_v2 }
  0x6d   :  { %382 = vmatpush1.bf16.msra.mxu1 %v719_v22 }
  0x6e   :  { %383 = vmatprep.subr.bf16.mxu1 %v720_v23 }
  0x6f   :  { %671 = vmatpush3.bf16.msra.mxu0 %v754_v3 }
  0x70   :  { %672 = vmatprep.subr.bf16.mxu0 %v755_v4 }
  0x71   :  { %384 = vmatpush1.bf16.msra.mxu1 %v722_v24 }
  0x72   :  { %385 = vmatprep.subr.bf16.mxu1 %v723_v25 }
  0x73   :  { %673 = vmatpush3.bf16.msra.mxu0 %v756_v5 }
  0x75   :  { %386 = vmatpush1.bf16.msra.mxu1 %v725_v26  ;;  %v586_v26 = vstv %s1010_s0 }
  0x76   :  { %387 = vmatprep.subr.bf16.mxu1 %v726_v27 }
  0x79   :  { %388 = vmatpush1.bf16.msra.mxu1 %v728_v28 }
  0x7a   :  { %389 = vmatprep.subr.bf16.mxu1 %v729_v29 }
  0x7d   :  { %390 = vmatpush1.bf16.msra.mxu1 %v731_v30 }
  0x7e   :  { %391 = vmatprep.subr.bf16.mxu1 %v732_v31 }
  0x81   :  { %392 = vmatpush1.bf16.msra.mxu1 %v734_v32 }
  0x82   :  { %393 = vmatprep.subr.bf16.mxu1 %v735_v33 }
  0x85   :  { %394 = vmatpush1.bf16.msra.mxu1 %v737_v34 }
  0x86   :  { %395 = vmatprep.subr.bf16.mxu1 %v738_v35 }
  0x89   :  { %396 = vmatpush1.bf16.msra.mxu1 %v740_v36 }
 0x122   :  { %v150_v56 = vpop.f32.mrb[0].mxu0 }
 0x123   :  { %v151_v57 = vadd.f32 %v150_v56, %v95_v54  ;;  %v152_v58 = vpop.f32.mrb[1].mxu0 }
 0x124   :  { %v153_v59 = vadd.f32 %v152_v58, %v99_v55  ;;  %v154_v60 = vpop.f32.mrb[2].mxu0 }
 0x125   :  { %v157_v61 = vmax.f32 %v151_v57, 0.0  ;;  %v155_v62 = vpop.f32.mrb[3].mxu0 }
 0x126   :  { %v158_v63 = vmax.f32 %v153_v59, 0.0 }
 0x127   :  { %v159_v1 = vpack.c.bf16 %v157_v61, %v157_v61 }
 0x128   :  { %v160_v0 = vpack.c.bf16 %v158_v63, %v158_v63 }
 0x12a   :  { %397 = vmatprep.mubr.bf16.mxu1 %v160_v0 }
 0x12b   :  { %398 = vmatmul.mubr.bf16.vlgmr.msra.gmra.mrb[0].mxu1 %v159_v1 }
 0x1fe   :  { %v399_v9 = vpop.f32.mrb[0].mxu1 }
 0x1ff   :  { %v400_v10 = vadd.f32 %v399_v9, %v198_v7  ;;  %v401_v11 = vpop.f32.mrb[1].mxu1 }
 0x200   :  { %v402_v12 = vadd.f32 %v401_v11, %v202_v8  ;;  %v403_v13 = vpop.f32.mrb[2].mxu1 }
 0x201   :  { %v406_v14 = vmax.f32 %v400_v10, 0.0  ;;  %v404_v15 = vpop.f32.mrb[3].mxu1 }
 0x202   :  { %v407_v16 = vmax.f32 %v402_v12, 0.0 }
 0x203   :  { %v408_v18 = vpack.c.bf16 %v406_v14, %v406_v14 }
 0x204   :  { %v409_v17 = vpack.c.bf16 %v407_v16, %v407_v16 }
 0x206   :  { %577 = vmatprep.mubr.bf16.mxu0 %v409_v17 }
 0x207   :  { %578 = vmatmul.mubr.bf16.vlgmr.msra.gmra.mrb[4].mxu0 %v408_v18 }
 0x2da   :  { %v674_v19 = vpop.f32.mrb[4].mxu0 }
 0x2db   :  { %v675_v21 = vpop.f32.mrb[5].mxu0 }
 0x2dc   :  { %v676_v22 = vadd.f32 %v675_v21, %v674_v19  ;;  %v677_v23 = vpop.f32.mrb[6].mxu0 }
 0x2dd   :  { %v678_v24 = vpop.f32.mrb[7].mxu0 }
 0x2de   :  { %v580_v25 = vadd.f32 %v676_v22, %v641_v20 }
 0x2e0   :  { %757 = vtanh.f32 %v580_v25 }
 0x2ea   :  { %v758_v27 = vpop.eup %757 }
 0x2eb   :  { %v587_v28 = vmul.f32 %v758_v27, %v586_v26 }
 0x2ed   :  { %588 = vst [vmem:[#allocation11] sm:$0xff] %v587_v28 }
 0x2ee   :  { %858 = shalt.err (!%p855_p8)
}
 0x2ef   :  { %s859_s1 = scalar_lea.hbm %s1018_s8, 128 }
 0x2f0   :  { %p860_p9 = scmp.ne.s32.totalorder %s1018_s8, %s859_s1  ;;  %p863_p10 = scmp.lt.u32.totalorder %s859_s1, %s1018_s8 }
 0x2f2   :  { %p865_p11 = pnand %p863_p10, %p860_p9 }
 0x2f4   :  { %868 = shalt.err (!%p865_p11)
}
 0x2f5   :  { %598 = dma.vmem_to_hbm [thread:$0]  %s596_s17, 128, %s1018_s8, [#allocation5]  }
 0x2f6   :  { %875 = dma.done.wait [#allocation5], 128  }
 0x2f7   :  { %876 = vsyncadd [#allocation5], 4294967168 }
 0x2f8   :  { %602 = vsyncpa [#allocation4], 1 }
 0x2f9   :  { %603 = vsyncpa [#allocation7], 1 }
 0x2fa   :  { %604 = vsyncpa [#allocation10], 1 }
 0x2fb   :  { %605 = vsyncpa [#allocation5], 1 }

</bundles_post_ra>
